<compile_context>
chip_gen: v7x
topology: tpu7x:2x2x1
jax: 0.10.0
libtpu: 0.0.40
codegen_flags: <defaults>
</compile_context>

<pallas_src>
import functools
import math

import jax
import jax.numpy as jnp
from jax.experimental import pallas as pl
from jax.experimental.pallas import tpu as pltpu


# ----------------------------------------------------------------------------
# Parameter / buffer setup (deterministic, mirrors PositionalEncoding.__init__)
# ----------------------------------------------------------------------------
def build_pe_table(max_len: int, d_model: int, dtype=jnp.float32) -> jnp.ndarray:
    position = jnp.arange(max_len, dtype=jnp.float32)[:, None]               # (L, 1)
    div_term = jnp.exp(
        jnp.arange(0, d_model, 2, dtype=jnp.float32) * -(math.log(10000.0) / d_model)
    )                                                                        # (ceil(D/2),)
    angles = position * div_term                                             # (L, ceil(D/2))
    pe = jnp.zeros((max_len, d_model), dtype=jnp.float32)
    pe = pe.at[:, 0::2].set(jnp.sin(angles))
    pe = pe.at[:, 1::2].set(jnp.cos(angles)[:, : d_model // 2])              # odd-D safe
    return pe.astype(dtype)


# ----------------------------------------------------------------------------
# Kernels
# ----------------------------------------------------------------------------
def _pe_add_kernel(x_ref, pe_ref, o_ref):
    # eval path (dropout is identity): out = x + pe  (lane-dense 2-D slab)
    o_ref[...] = (x_ref[...] + pe_ref[...]).astype(o_ref.dtype)


def _srl32(x, n):
    # Logical right shift for int32: arithmetic shift, then clear the
    # sign-extended high bits (avoids relying on unsigned ops in the kernel).
    return (x >> n) & jnp.int32((1 << (32 - n)) - 1)


def _pe_add_dropout_kernel(seed_ref, x_ref, pe_ref, o_ref, *,
                           p, threshold, tb, tc, ncols):
    # training path: out = inverted-dropout(x + pe, p)
    y = x_ref[...] + pe_ref[...]                       # (TB, TC), input dtype

    # Stateless counter-based RNG: murmur3-style finalizer over the global
    # element index mixed with the seed. Deterministic per (seed, position),
    # independent of tiling / grid order -> both grid axes can be "parallel".
    # (Does not bit-match torch's RNG stream -- documented, acceptable.)
    i = pl.program_id(0)
    j = pl.program_id(1)
    rows = jax.lax.broadcasted_iota(jnp.int32, (tb, tc), 0) + i * tb
    cols = jax.lax.broadcasted_iota(jnp.int32, (tb, tc), 1) + j * tc
    idx = rows * ncols + cols                          # int32 wrap is fine for hashing

    h = idx * jnp.int32(-1640531527) + seed_ref[0]     # 0x9E3779B9 (golden ratio)
    h = h ^ _srl32(h, 16)
    h = h * jnp.int32(-2048144789)                     # 0x85ebca6b
    h = h ^ _srl32(h, 13)
    h = h * jnp.int32(-1028477387)                     # 0xc2b2ae35
    h = h ^ _srl32(h, 16)
    r = h & jnp.int32(0x7FFFFFFF)                      # uniform in [0, 2^31)

    keep = r >= jnp.int32(threshold)                   # P(keep) = 1 - p
    scale = 1.0 / (1.0 - p)
    o_ref[...] = jnp.where(keep, y * scale, jnp.zeros_like(y)).astype(o_ref.dtype)


# ----------------------------------------------------------------------------
# Wrapper
# ----------------------------------------------------------------------------
_MAX_ROW_TILE = 64      # multiple of 8   (sublane unit)
_MAX_COL_TILE = 8192    # multiple of 128 (lane unit); 64*8192*4B = 2 MiB / block


def positional_encoding_forward(x, pe, *, p=0.1, training=False, seed=0):
    """x: (B, S, D); pe: (max_len, D). Returns dropout(x + pe[:S])."""
    B, S, D = x.shape
    C = S * D
    x2 = x.reshape(B, C)                                # lane-dense view
    pe2 = pe[:S, :].astype(x.dtype).reshape(1, C)       # broadcast row

    TB = B if B <= _MAX_ROW_TILE else _MAX_ROW_TILE
    TC = C if C <= _MAX_COL_TILE else _MAX_COL_TILE
    grid = (pl.cdiv(B, TB), pl.cdiv(C, TC))

    compiler_params = pltpu.CompilerParams(
        dimension_semantics=("parallel", "parallel"),
        vmem_limit_bytes=32 * 1024 * 1024,
    )
    out_shape = jax.ShapeDtypeStruct((B, C), x.dtype)

    if (not training) or p == 0.0:
        out2 = pl.pallas_call(
            _pe_add_kernel,
            out_shape=out_shape,
            grid_spec=pltpu.PrefetchScalarGridSpec(
                num_scalar_prefetch=0,
                grid=grid,
                in_specs=[
                    pl.BlockSpec((TB, TC), lambda i, j: (i, j)),
                    pl.BlockSpec((1, TC), lambda i, j: (0, j)),   # reused across rows
                ],
                out_specs=pl.BlockSpec((TB, TC), lambda i, j: (i, j)),
            ),
            compiler_params=compiler_params,
        )(x2, pe2)
        return out2.reshape(B, S, D)

    threshold = min(int(round(float(p) * 2147483648.0)), 2147483647)
    kernel = functools.partial(
        _pe_add_dropout_kernel,
        p=float(p), threshold=threshold, tb=TB, tc=TC, ncols=C,
    )
    seed_arr = jnp.asarray([seed], dtype=jnp.int32)
    out2 = pl.pallas_call(
        kernel,
        out_shape=out_shape,
        grid_spec=pltpu.PrefetchScalarGridSpec(
            num_scalar_prefetch=1,
            grid=grid,
            in_specs=[
                pl.BlockSpec((TB, TC), lambda i, j, s: (i, j)),
                pl.BlockSpec((1, TC), lambda i, j, s: (0, j)),    # reused across rows
            ],
            out_specs=pl.BlockSpec((TB, TC), lambda i, j, s: (i, j)),
        ),
        compiler_params=compiler_params,
    )(seed_arr, x2, pe2)
    return out2.reshape(B, S, D)


# ----------------------------------------------------------------------------
# Main
# ----------------------------------------------------------------------------
if __name__ == "__main__":
    key = jax.random.PRNGKey(0)
    B, S, D = 2, 8, 32          # batch, seq, d_model
    MAX_LEN = 64                # small stand-in for max_len=5000
    P_DROPOUT = 0.1

    x = jax.random.normal(key, (B, S, D), dtype=jnp.float32)
    pe = build_pe_table(MAX_LEN, D)

    # Eval-mode forward (dropout = identity): check against pure-JAX reference.
    out_eval = positional_encoding_forward(x, pe, p=P_DROPOUT, training=False)
    out_eval = jax.block_until_ready(out_eval)
    ref = x + pe[None, :S, :]
    assert out_eval.shape == (B, S, D)
    assert jnp.allclose(out_eval, ref, atol=1e-6, rtol=1e-6)

    # Training-mode forward (stochastic dropout inside the kernel).
    out_train = positional_encoding_forward(x, pe, p=P_DROPOUT, training=True, seed=1234)
    out_train = jax.block_until_ready(out_train)
    assert out_train.shape == (B, S, D)
    # Every surviving element must equal ref * 1/(1-p); dropped ones are 0.
    scaled = ref / (1.0 - P_DROPOUT)
    ok = jnp.logical_or(jnp.isclose(out_train, scaled, rtol=1e-5, atol=1e-6),
                        out_train == 0.0)
    assert bool(jnp.all(ok))
    # Dropout actually happened and keep-rate is in a sane range.
    keep_frac = float(jnp.mean((out_train != 0.0).astype(jnp.float32)))
    assert 0.5 < keep_frac < 1.0

    print("KERNEL_OK")
</pallas_src>

<mosaic_0001>
module attributes {stable_mosaic.version = 11 : i64} {
  func.func @_pe_add_kernel(%arg0: i32, %arg1: i32, %arg2: memref<2x256xf32, #tpu.memory_space<vmem>>, %arg3: memref<1x256xf32, #tpu.memory_space<vmem>>, %arg4: memref<2x256xf32, #tpu.memory_space<vmem>>) attributes {dimension_semantics = [#tpu.dimension_semantics<parallel>, #tpu.dimension_semantics<parallel>], iteration_bounds = array<i64: 1, 1>, scalar_prefetch = 0 : i64, scratch_operands = 0 : i64, tpu.core_type = #tpu.core_type<tc>, window_params = [{transform_indices = @transform_0, window_bounds = array<i64: 2, 256>}, {transform_indices = @transform_1, window_bounds = array<i64: 1, 256>}, {transform_indices = @transform_2, window_bounds = array<i64: 2, 256>}]} {
    %c0 = arith.constant 0 : index
    %c0_0 = arith.constant 0 : index
    %0 = vector.load %arg2[%c0, %c0_0] : memref<2x256xf32, #tpu.memory_space<vmem>>, vector<2x256xf32>
    %c0_1 = arith.constant 0 : index
    %c0_2 = arith.constant 0 : index
    %1 = vector.load %arg3[%c0_1, %c0_2] : memref<1x256xf32, #tpu.memory_space<vmem>>, vector<1x256xf32>
    %2 = vector.broadcast %1 : vector<1x256xf32> to vector<2x256xf32>
    %3 = arith.addf %0, %2 : vector<2x256xf32>
    %c0_3 = arith.constant 0 : index
    %c0_4 = arith.constant 0 : index
    %4 = vector.load %arg4[%c0_3, %c0_4] : memref<2x256xf32, #tpu.memory_space<vmem>>, vector<2x256xf32>
    tpu.vector_store %arg4[%c0_3, %c0_4], %3 {strides = array<i32>} : memref<2x256xf32, #tpu.memory_space<vmem>>, vector<2x256xf32>,
    return
  }
  func.func @transform_0(%arg0: i32, %arg1: i32) -> (i32, i32) {
    %c0_i32 = arith.constant 0 : i32
    return %arg0, %arg1 : i32, i32
  }
  func.func @transform_1(%arg0: i32, %arg1: i32) -> (i32, i32) {
    %c0_i32 = arith.constant 0 : i32
    %c0_i32_0 = arith.constant 0 : i32
    return %c0_i32, %arg1 : i32, i32
  }
  func.func @transform_2(%arg0: i32, %arg1: i32) -> (i32, i32) {
    %c0_i32 = arith.constant 0 : i32
    return %arg0, %arg1 : i32, i32
  }
}

</mosaic_0001>

<bundles_post_ra>
// kernel: tpu_custom_call.1
= control target key start
LH: loop header
LB: loop body
LE: loop exit
PB: predicated region body
PF: predicated region fallthrough
CT: control target
= control target key end

     0   :  { %7 = vsyncpa [#allocation3], 0  ;;  %s157_s0 = inlined_call_operand.hbm [shape: f32[2,256], index: 0, kind: input, shape index: {}]   ;;  %s158_s1 = inlined_call_operand.vmem [shape: f32[1,256], index: 1, kind: input, shape index: {}]   ;;  %s159_s2 = inlined_call_operand.hbm [shape: f32[2,256], index: 2, kind: output, shape index: {}]  }
   0x1   :  { %8 = vsyncpa [#allocation4], 0  ;;  %s112_s9 = smov [#allocation2]   ;;  %s64_s13 = scalar_lea.hbm %s157_s0, 64 }
   0x2   :  { %s15_s10 = sshll.u32 %s112_s9, 4  ;;  %p65_p0 = scmp.ne.s32.totalorder %s157_s0, %s64_s13  ;;  %s16_s10 = int_to_ptr.vmem [resolvable:$true] %s15_s10 }
   0x3   :  { %p68_p1 = scmp.lt.u32.totalorder %s64_s13, %s157_s0 }
   0x5   :  { %p70_p2 = pnand %p68_p1, %p65_p0 }
   0x7   :  { %73 = shalt.err (!%p70_p2)
}
   0x8   :  { %s74_s18 = scalar_lea.vmem %s16_s10, 64  ;;  %p79_p4 = scmp.lt.s32.totalorder %s16_s10, %s16_s10 }
   0x9   :  { %p75_p3 = scmp.ne.s32.totalorder %s16_s10, %s74_s18  ;;  %p80_p5 = scmp.lt.s32.totalorder %s74_s18, %s74_s18 }
   0xb   :  { %p81_p6 = por %p80_p5, %p79_p4 }
   0xd   :  { %p82_p7 = pnand %p81_p6, %p75_p3 }
   0xf   :  { %85 = shalt.err (!%p82_p7)
}
  0x10   :  { %18 = dma.hbm_to_vmem [thread:$0]  %s157_s0, 64, %s16_s10, [#allocation3]  }
  0x11   :  { %108 = dma.done.wait [#allocation3], 64  }
  0x12   :  { %109 = vsyncadd [#allocation3], 4294967232  ;;  %v27_v0 = vlaneseq  ;;  %v113_v1 = vmov 1983009808   ;;  %v25_v7 = vld [vmem:[%s158_s1] sm:$0x3] }
  0x13   :  { %v37_v2 = vunpack.c.l.s4 %v113_v1  ;;  %v24_v12 = vld [vmem:[#allocation2] sm:$0xf]  ;;  %s114_s23 = smov [#allocation5]  }
  0x14   :  { %v28_v3 = vshrl.u32 %v27_v0, 7  ;;  %s52_s0 = sshll.u32 %s114_s23, 4  ;;  %s53_s0 = int_to_ptr.vmem [resolvable:$true] %s52_s0 }
  0x15   :  { %v38_v6 = vunpack.c.0.s8 %v37_v2  ;;  %s86_s24 = scalar_lea.vmem %s53_s0, 64  ;;  %p91_p9 = scmp.lt.s32.totalorder %s53_s0, %s53_s0 }
  0x16   :  { %v29_v4 = vsub.s32 0, %v28_v3  ;;  %v33_v5 = vsub.s32 1, %v28_v3  ;;  %p87_p8 = scmp.ne.s32.totalorder %s53_s0, %s86_s24  ;;  %p92_p10 = scmp.lt.s32.totalorder %s86_s24, %s86_s24 }
  0x17   :  { %v41_v10 = vsub.s32 %v38_v6, %v28_v3 }
  0x18   :  { %v30_v8 = vrot.slane %v25_v7, %v29_v4  ;;  %v34_v9 = vrot.slane %v25_v7, %v33_v5  ;;  %p93_p11 = por %p92_p10, %p91_p9 }
  0x1a   :  { %v35_v11 = vcombine.low %v30_v8, %v34_v9  ;;  %p94_p12 = pnand %p93_p11, %p87_p8 }
  0x1c   :  { %v42_v13 = vrot.slane %v35_v11, %v41_v10 }
  0x1e   :  { %v44_v14 = vadd.f32 %v42_v13, %v24_v12 }
  0x20   :  { %45 = vst [vmem:[#allocation5] sm:$0xf] %v44_v14 }
  0x21   :  { %97 = shalt.err (!%p94_p12)
}
  0x22   :  { %s98_s26 = scalar_lea.hbm %s159_s2, 64 }
  0x23   :  { %p99_p13 = scmp.ne.s32.totalorder %s159_s2, %s98_s26  ;;  %p102_p0 = scmp.lt.u32.totalorder %s98_s26, %s159_s2 }
  0x25   :  { %p104_p1 = pnand %p102_p0, %p99_p13 }
  0x27   :  { %107 = shalt.err (!%p104_p1)
}
  0x28   :  { %55 = dma.vmem_to_hbm [thread:$0]  %s53_s0, 64, %s159_s2, [#allocation4]  }
  0x29   :  { %110 = dma.done.wait [#allocation4], 64  }
  0x2a   :  { %111 = vsyncadd [#allocation4], 4294967232 }
  0x2b   :  { %59 = vsyncpa [#allocation3], 1 }
  0x2c   :  { %60 = vsyncpa [#allocation4], 1 }

</bundles_post_ra>
